<compile_context>
chip_gen: v7x
topology: tpu7x:2x2x1
jax: 0.10.0
libtpu: 0.0.40
codegen_flags: <defaults>
</compile_context>

<pallas_src>
import functools

import jax
import jax.numpy as jnp
from jax import lax
from jax.experimental import pallas as pl
from jax.experimental.pallas import tpu as pltpu


def _round_up(x, m):
    return (x + m - 1) // m * m


# --------------------------- kernel 1: fused affine -------------------------- #
def _linear_kernel(wT_ref, xT_ref, bT_ref, hT_ref):
    """hT_tile = W_fused^T @ x_tile^T + b_fused^T   (single MXU matmul)."""
    acc = jnp.dot(wT_ref[...], xT_ref[...], preferred_element_type=jnp.float32)
    hT_ref[...] = (acc + bT_ref[...]).astype(hT_ref.dtype)


# --------------------------- kernel 2: edge sampling ------------------------- #
def _edge_sample_kernel(hT_ref, src_ref, dst_ref, adjw_ref, noise_ref, out_ref,
                        *, alpha, temp, n_pad):
    """Fused gather (one-hot MXU), sigmoid, alpha-mix, RelaxedBernoulli-ST."""
    eps = jnp.float32(jnp.finfo(jnp.float32).eps)
    te = src_ref.shape[-1]

    # --- gather h[src], h[dst] on the MXU: hT [H, N_pad] @ onehot [N_pad, TE]
    node_iota = lax.broadcasted_iota(jnp.int32, (n_pad, te), 0)
    onehot_s = (node_iota == src_ref[...]).astype(jnp.float32)      # [N_pad, TE]
    onehot_d = (node_iota == dst_ref[...]).astype(jnp.float32)

    hT = hT_ref[...]                                                # [H, N_pad]
    hsT = jnp.dot(hT, onehot_s, preferred_element_type=jnp.float32)  # [H, TE]
    hdT = jnp.dot(hT, onehot_d, preferred_element_type=jnp.float32)  # [H, TE]

    # edge_logits = sigmoid(sum_f h[src]*h[dst])   (reduce over sublanes)
    dots = jnp.sum(hsT * hdT, axis=0, keepdims=True)                # [1, TE]
    edge_logits = 1.0 / (1.0 + jnp.exp(-dots))

    # edge_probs = logits*(1-alpha) + alpha*adj_weight, clamped
    probs = edge_logits * (1.0 - alpha) + alpha * adjw_ref[...]
    probs = jnp.clip(probs, eps, 1.0 - eps)

    # RelaxedBernoulli rsample: logit(p) + logistic noise, one fused log
    u = jnp.clip(noise_ref[...], eps, 1.0 - eps)
    z = jnp.log((probs * u) / ((1.0 - probs) * (1.0 - u)))
    soft = 1.0 / (1.0 + jnp.exp(-z / jnp.float32(temp)))
    soft = jnp.clip(soft, eps, 1.0 - eps)

    # TODO(synk): straight-through *gradient* (custom_vjp) not implemented;
    # forward value semantics only (hard = round(soft)).
    out_ref[...] = jnp.where(soft > 0.5, 1.0, 0.0).astype(out_ref.dtype)


# --------------------------------- wrapper ----------------------------------- #
class EdgeSamplerPallas:
    def __init__(self, in_dim, hid_dim, param, key):
        k1, k2, k3, k4 = jax.random.split(key, 4)
        lim1 = 1.0 / (in_dim ** 0.5)
        lim2 = 1.0 / (hid_dim ** 0.5)
        w1 = jax.random.uniform(k1, (in_dim, hid_dim), jnp.float32, -lim1, lim1)
        b1 = jax.random.uniform(k2, (hid_dim,), jnp.float32, -lim1, lim1)
        w2 = jax.random.uniform(k3, (hid_dim, hid_dim), jnp.float32, -lim2, lim2)
        b2 = jax.random.uniform(k4, (hid_dim,), jnp.float32, -lim2, lim2)

        # No activation between the two nn.Linear layers -> fuse them offline.
        w_fused = w1 @ w2                       # [in, hid]
        b_fused = b1 @ w2 + b2                  # [hid]

        # Pad hidden dim to a multiple of 128 (lane-dense); zero columns do not
        # change the src·dst dot products.
        H = _round_up(hid_dim, 128)
        self.H = H
        self.in_dim = in_dim
        self.wT = jnp.zeros((H, in_dim), jnp.float32).at[:hid_dim, :].set(w_fused.T)
        self.bT = jnp.zeros((H, 1), jnp.float32).at[:hid_dim, 0].set(b_fused)
        self.alpha = float(param['alpha'])
        self.temp = float(param['temp'])

    def __call__(self, x, src, dst, adj_weight, noise_key, *,
                 node_tile=512, edge_tile=2048):
        N, in_dim = x.shape
        E = src.shape[0]
        H = self.H

        # ------------- stage 1: hT = (x @ W_fused + b_fused)^T --------------
        tn = min(node_tile, _round_up(N, 128))
        n_pad = _round_up(N, tn)
        xT = jnp.zeros((in_dim, n_pad), jnp.float32).at[:, :N].set(x.T)

        hT = pl.pallas_call(
            _linear_kernel,
            out_shape=jax.ShapeDtypeStruct((H, n_pad), jnp.float32),
            grid=(n_pad // tn,),
            in_specs=[
                pl.BlockSpec((H, in_dim), lambda i: (0, 0)),   # W^T (replicated)
                pl.BlockSpec((in_dim, tn), lambda i: (0, i)),  # x^T node tile
                pl.BlockSpec((H, 1), lambda i: (0, 0)),        # b^T (replicated)
            ],
            out_specs=pl.BlockSpec((H, tn), lambda i: (0, i)),
            compiler_params=pltpu.CompilerParams(
                dimension_semantics=("parallel",)),
        )(self.wT, xT, self.bT)

        # ------------- stage 2: per-edge sampling, tiled over edges ----------
        te = min(edge_tile, _round_up(E, 128))
        e_pad = _round_up(E, te)

        def _pad_row(v, fill, dtype):
            out = jnp.full((1, e_pad), fill, dtype)
            return out.at[0, :E].set(v.astype(dtype))

        src2 = _pad_row(src, 0, jnp.int32)
        dst2 = _pad_row(dst, 0, jnp.int32)
        adjw2 = _pad_row(adj_weight, 0.0, jnp.float32)
        # Uniform noise for the logistic perturbation (generated host-side;
        # one independent draw per edge, so tiles are not correlated).
        noise = jax.random.uniform(noise_key, (1, e_pad), jnp.float32)

        kern = functools.partial(_edge_sample_kernel, alpha=self.alpha,
                                 temp=self.temp, n_pad=n_pad)
        out = pl.pallas_call(
            kern,
            out_shape=jax.ShapeDtypeStruct((1, e_pad), jnp.float32),
            grid=(e_pad // te,),
            in_specs=[
                pl.BlockSpec((H, n_pad), lambda i: (0, 0)),  # hT (VMEM-resident)
                pl.BlockSpec((1, te), lambda i: (0, i)),     # src tile
                pl.BlockSpec((1, te), lambda i: (0, i)),     # dst tile
                pl.BlockSpec((1, te), lambda i: (0, i)),     # adj_weight tile
                pl.BlockSpec((1, te), lambda i: (0, i)),     # uniform noise tile
            ],
            out_specs=pl.BlockSpec((1, te), lambda i: (0, i)),
            compiler_params=pltpu.CompilerParams(
                dimension_semantics=("parallel",)),
        )(hT, src2, dst2, adjw2, noise)

        return out[0, :E]                                    # [E]


# ----------------------------------- demo ------------------------------------ #
if __name__ == "__main__":
    key = jax.random.PRNGKey(0)
    k_param, k_x, k_src, k_dst, k_w, k_noise = jax.random.split(key, 6)

    N, in_dim, hid_dim, E = 300, 8, 32, 700
    param = {"alpha": 0.3, "temp": 0.5}

    sampler = EdgeSamplerPallas(in_dim, hid_dim, param, k_param)

    x = jax.random.normal(k_x, (N, in_dim), jnp.float32)
    src = jax.random.randint(k_src, (E,), 0, N, jnp.int32)
    dst = jax.random.randint(k_dst, (E,), 0, N, jnp.int32)
    adj_weight = jax.random.uniform(k_w, (E,), jnp.float32)

    # small tiles so the demo exercises multi-step grids on both kernels
    edge_sampled = sampler(x, src, dst, adj_weight, k_noise,
                           node_tile=128, edge_tile=256)
    edge_sampled = jax.block_until_ready(edge_sampled)

    assert edge_sampled.shape == (E,)
    assert bool(jnp.all((edge_sampled == 0.0) | (edge_sampled == 1.0)))
    print("KERNEL_OK")
</pallas_src>

<mosaic_0001>
module attributes {stable_mosaic.version = 11 : i64} {
  func.func @_linear_kernel(%arg0: i32, %arg1: memref<128x8xf32, #tpu.memory_space<vmem>>, %arg2: memref<8x128xf32, #tpu.memory_space<vmem>>, %arg3: memref<128x1xf32, #tpu.memory_space<vmem>>, %arg4: memref<128x128xf32, #tpu.memory_space<vmem>>) attributes {dimension_semantics = [#tpu.dimension_semantics<parallel>], iteration_bounds = array<i64: 3>, scalar_prefetch = 0 : i64, scratch_operands = 0 : i64, tpu.core_type = #tpu.core_type<tc>, window_params = [{pipeline_mode = #tpu.pipeline_mode<synchronous>, transform_indices = @transform_0, window_bounds = array<i64: 128, 8>}, {transform_indices = @transform_1, window_bounds = array<i64: 8, 128>}, {pipeline_mode = #tpu.pipeline_mode<synchronous>, transform_indices = @transform_2, window_bounds = array<i64: 128, 1>}, {transform_indices = @transform_3, window_bounds = array<i64: 128, 128>}]} {
    %c0 = arith.constant 0 : index
    %c0_0 = arith.constant 0 : index
    %0 = vector.load %arg1[%c0, %c0_0] : memref<128x8xf32, #tpu.memory_space<vmem>>, vector<128x8xf32>
    %c0_1 = arith.constant 0 : index
    %c0_2 = arith.constant 0 : index
    %1 = vector.load %arg2[%c0_1, %c0_2] : memref<8x128xf32, #tpu.memory_space<vmem>>, vector<8x128xf32>
    %cst = arith.constant dense<0.000000e+00> : vector<128x128xf32>
    %2 = tpu.matmul %0, %1, %cst {dimension_numbers = #tpu.dot_dimension_numbers<[1], [0], [0], [1], [0, 0, 1, 1], [], []>} : vector<128x8xf32>, vector<8x128xf32>, vector<128x128xf32> -> vector<128x128xf32>
    %c0_3 = arith.constant 0 : index
    %c0_4 = arith.constant 0 : index
    %3 = vector.load %arg3[%c0_3, %c0_4] : memref<128x1xf32, #tpu.memory_space<vmem>>, vector<128x1xf32>
    %4 = vector.broadcast %3 : vector<128x1xf32> to vector<128x128xf32>
    %5 = arith.addf %2, %4 : vector<128x128xf32>
    %c0_5 = arith.constant 0 : index
    %c0_6 = arith.constant 0 : index
    %6 = vector.load %arg4[%c0_5, %c0_6] : memref<128x128xf32, #tpu.memory_space<vmem>>, vector<128x128xf32>
    tpu.vector_store %arg4[%c0_5, %c0_6], %5 {strides = array<i32>} : memref<128x128xf32, #tpu.memory_space<vmem>>, vector<128x128xf32>,
    return
  }
  func.func @transform_0(%arg0: i32) -> (i32, i32) {
    %c0_i32 = arith.constant 0 : i32
    %c0_i32_0 = arith.constant 0 : i32
    %c0_i32_1 = arith.constant 0 : i32
    return %c0_i32, %c0_i32_0 : i32, i32
  }
  func.func @transform_1(%arg0: i32) -> (i32, i32) {
    %c0_i32 = arith.constant 0 : i32
    %c0_i32_0 = arith.constant 0 : i32
    return %c0_i32, %arg0 : i32, i32
  }
  func.func @transform_2(%arg0: i32) -> (i32, i32) {
    %c0_i32 = arith.constant 0 : i32
    %c0_i32_0 = arith.constant 0 : i32
    %c0_i32_1 = arith.constant 0 : i32
    return %c0_i32, %c0_i32_0 : i32, i32
  }
  func.func @transform_3(%arg0: i32) -> (i32, i32) {
    %c0_i32 = arith.constant 0 : i32
    %c0_i32_0 = arith.constant 0 : i32
    return %c0_i32, %arg0 : i32, i32
  }
}

</mosaic_0001>

<bundles_post_ra>
// kernel: tpu_custom_call.1
= control target key start
LH: loop header
LB: loop body
LE: loop exit
PB: predicated region body
PF: predicated region fallthrough
CT: control target
= control target key end

     0   :  { %8 = vsyncpa [#allocation3], 0  ;;  %s1007_s0 = inlined_call_operand.vmem [shape: f32[128,8], index: 0, kind: input, shape index: {}]   ;;  %s1008_s1 = inlined_call_operand.vmem [shape: f32[8,384], index: 1, kind: input, shape index: {}]   ;;  %s1009_s2 = inlined_call_operand.vmem [shape: f32[128,1], index: 2, kind: input, shape index: {}]   ;;  %s1010_s3 = inlined_call_operand.hbm [shape: f32[128,384], index: 3, kind: output, shape index: {}]  }
   0x1   :  { %10 = vsyncpa [#allocation3 + $0x1], 0  ;;  %s769_s12 = smov 0   ;;  %s771_s13 = smov 0  }
   0x2   :  { %s773_s14 = smov 0   ;;  %s775_s15 = smov 0  }
   0x3 LB: > { %s790_s16 = sadd.s32 4294967295, %s742_s15   ;;  %s564_s17 = sadd.s32 4294967294, %s742_s15   ;;  %s742_s15 = sphi %s775_s15, %s1016_s15   ;;  %s738_s14 = sphi %s773_s14, %s1015_s14   ;;  %s734_s13 = sphi %s771_s13, %s1014_s13   ;;  %s730_s12 = sphi %s769_s12, %s1013_s12  }
   0x4   : > { %s794_s18 = sadd.s32 1, %s742_s15   ;;  %s91_s19 = sadd.s32 1, %s738_s14 }
   0x5   : > { %s88_s20 = ssub.s32 %s742_s15, %s794_s18  ;;  %p101_p0 = scmp.ne.s32.totalorder %s738_s14, %s734_s13 }
   0x6   : > { %p89_p1 = scmp.eq.s32.totalorder %s88_s20, 0  ;;  %p102_p2 = scmp.eq.s32.totalorder %s790_s16, 2 }
   0x7   : > { %p107_p3 = scmp.ne.s32.totalorder %s734_s13, %s730_s12  ;;  %p108_p4 = scmp.eq.s32.totalorder %s564_s17, 2 }
   0x8   : > { %s805_s21 = scalar_select %p89_p1, %s738_s14, %s91_s19  }
   0x9   : > { %p807_p5 = por %p102_p2, %p101_p0  ;;  %p811_p6 = por %p108_p4, %p107_p3 }
   0xa   : > { %p567_p7 = scmp.ge.s32.totalorder %s742_s15, 1  ;;  %p139_p8 = scmp.lt.s32.totalorder %s742_s15, 4 }
   0xc   : > { %p140_p9 = pnand %p567_p7, %p139_p8 }
   0xd   : > { %p162_p10 = scmp.lt.s32.totalorder (!%p140_p9), %s790_s16, 2  ;;  %v166_v0 = vld [vmem:[%s1007_s0] sm:$0xff] (!%p140_p9)  ;;  %vm279_vm0 = vcmask (!%p140_p9), 64512   ;;  %v744_v2 = vmov (!%p140_p9), 0   ;;  %v185_v3 = vld [vmem:[%s1009_s2 + $0x10] sm:$0xff] (!%p140_p9)  ;;  %v167_v6 = vld [vmem:[%s1007_s0 + $0x8] sm:$0xff] (!%p140_p9) }
   0xe   : > { %143 = sbr.rel (%p140_p9) target bundleno = 271 (0x10f), region = 32  ;;  %v174_v1 = vld [vmem:[%s1007_s0 + $0x40] sm:$0xff] (!%p140_p9)  ;;  %609 = vmatprep.mubr.msk.f32.mxu0 (!%p140_p9), %vm279_vm0, %v166_v0  ;;  %679 = vset.pattern.permute.xlu1 (!%p140_p9), %v744_v2  ;;  %v175_v7 = vld [vmem:[%s1007_s0 + $0x48] sm:$0xff] (!%p140_p9)  ;;  %v168_v8 = vld [vmem:[%s1007_s0 + $0x10] sm:$0xff] (!%p140_p9)  ;;  %s159_s17 = sand.u32 (!%p140_p9), 1, %s734_s13  }
   0xf   : > { %621 = vmatprep.mubr.msk.f32.mxu1 (!%p140_p9), %vm279_vm0, %v174_v1  ;;  %678 = vset.pattern.permute.xlu0 (!%p140_p9), %v744_v2  ;;  %v183_v4 = vld [vmem:[%s1009_s2] sm:$0xff] (!%p140_p9)  ;;  %v176_v9 = vld [vmem:[%s1007_s0 + $0x50] sm:$0xff] (!%p140_p9)  ;;  %v186_v10 = vld [vmem:[%s1009_s2 + $0x18] sm:$0xff] (!%p140_p9)  ;;  %s568_s19 = sshll.u32 (!%p140_p9), %s159_s17, 7  ;;  %s587_s24 = sshll.u32 (!%p140_p9), %s790_s16, 7 }
  0x10   : > { %211 = vperm.xlu1 (!%p140_p9), %679, %v185_v3   ;;  %201 = vperm.xlu0 (!%p140_p9), %678, %v183_v4   ;;  %v184_v11 = vld [vmem:[%s1009_s2 + $0x8] sm:$0xff] (!%p140_p9)  ;;  %v169_v12 = vld [vmem:[%s1007_s0 + $0x18] sm:$0xff] (!%p140_p9)  ;;  %v170_v14 = vld [vmem:[%s1007_s0 + $0x20] sm:$0xff] (!%p140_p9)  ;;  %s937_s20 = scalar_lea.vmem (!%p140_p9), [#allocation2], %s568_s19  ;;  %s745_s30 = smov (!%p140_p9), [#allocation2]  }
  0x11   : > { %v177_v13 = vld [vmem:[%s1007_s0 + $0x58] sm:$0xff] (!%p140_p9)  ;;  %v178_v15 = vld [vmem:[%s1007_s0 + $0x60] sm:$0xff] (!%p140_p9)  ;;  %v188_v16 = vld [vmem:[%s1009_s2 + $0x28] sm:$0xff] (!%p140_p9)  ;;  %s502_s25 = sshll.u32 (!%p140_p9), %s937_s20, 4  ;;  %s684_s4 = sshll.u32 (!%p140_p9), %s745_s30, 4  ;;  %s958_s25 = int_to_ptr.vmem [resolvable:$true] %s502_s25  ;;  %s685_s4 = int_to_ptr.vmem [resolvable:$false] %s684_s4 }
  0x12   : > { %v187_v17 = vld [vmem:[%s1009_s2 + $0x20] sm:$0xff] (!%p140_p9)  ;;  %v171_v18 = vld [vmem:[%s1007_s0 + $0x28] sm:$0xff] (!%p140_p9)  ;;  %v172_v20 = vld [vmem:[%s1007_s0 + $0x30] sm:$0xff] (!%p140_p9)  ;;  %p687_p0 = scmp.lt.s32.totalorder (!%p140_p9), %s958_s25, %s685_s4 }
  0x13   : > { %v179_v19 = vld [vmem:[%s1007_s0 + $0x68] sm:$0xff] (!%p140_p9)  ;;  %v180_v21 = vld [vmem:[%s1007_s0 + $0x70] sm:$0xff] (!%p140_p9)  ;;  %v190_v22 = vld [vmem:[%s1009_s2 + $0x38] sm:$0xff] (!%p140_p9) }
  0x14   : > { %216 = vperm.xlu1 (!%p140_p9), %679, %v186_v10   ;;  %206 = vperm.xlu0 (!%p140_p9), %678, %v184_v11   ;;  %v189_v23 = vld [vmem:[%s1009_s2 + $0x30] sm:$0xff] (!%p140_p9)  ;;  %v173_v24 = vld [vmem:[%s1007_s0 + $0x38] sm:$0xff] (!%p140_p9)  ;;  %v192_v26 = vld [vmem:[%s1009_s2 + $0x48] sm:$0xff] (!%p140_p9) }
  0x15   : > { %s163_s28 = scalar_select %p162_p10, %s790_s16, 2  ;;  %v181_v25 = vld [vmem:[%s1007_s0 + $0x78] sm:$0xff]  ;;  %v191_v27 = vld [vmem:[%s1009_s2 + $0x40] sm:$0xff]  ;;  %v193_v29 = vld [vmem:[%s1009_s2 + $0x50] sm:$0xff] }
  0x16   : > { %v194_v28 = vld [vmem:[%s1009_s2 + $0x58] sm:$0xff]  ;;  %v196_v30 = vld [vmem:[%s1009_s2 + $0x68] sm:$0xff]  ;;  %v195_v31 = vld [vmem:[%s1009_s2 + $0x60] sm:$0xff]  ;;  %s956_s16 = scalar_lea.hbm %s1010_s3, %s587_s24 }
  0x17   : > { %s569_s29 = sshll.u32 %s163_s28, 3  ;;  %v198_v32 = vld [vmem:[%s1009_s2 + $0x78] sm:$0xff]  ;;  %v197_v33 = vld [vmem:[%s1009_s2 + $0x70] sm:$0xff]  ;;  %s966_s28 = scalar_lea.sflag [#allocation3], %s159_s17 }
  0x18   : > { %s165_s5 = scalar_lea.vmem %s1008_s1, %s569_s29  ;;  %226 = vperm.xlu1 %679, %v188_v16   ;;  %221 = vperm.xlu0 %678, %v187_v17   ;;  %s680_s29 = scalar_lea.vmem %s958_s25, 2048 }
  0x19   : > { %v182_v5 = vld [vmem:[%s165_s5] sm:$0xff]  ;;  %p681_p11 = scmp.ne.s32.totalorder %s958_s25, %s680_s29  ;;  %s686_s5 = scalar_lea.vmem %s685_s4, 4096 }
  0x1a   : > { %607 = vmatprep.subr.mxu0 %v182_v5  ;;  %633 = vmatprep.subr.mxu1 %v182_v5  ;;  %p688_p1 = scmp.lt.s32.totalorder %s686_s5, %s680_s29 }
  0x1b   : > { %608 = vmatpush3.msra.mxu0 %v182_v5  ;;  %634 = vmatpush3.msra.mxu1 %v182_v5  ;;  %p682_p12 = pnand %p681_p11, %p807_p5 }
  0x1c   : > { %610 = vmatmul.mubr.msk.f32.vlgmr.msra.gmra.mrb[0].mxu0 %vm279_vm0, %v167_v6  ;;  %622 = vmatmul.mubr.msk.f32.vlgmr.msra.gmra.mrb[0].mxu1 %vm279_vm0, %v175_v7  ;;  %p689_p2 = por %p688_p1, %p687_p0 }
  0x1d   : > { %612 = vmatprep.mubr.msk.f32.mxu0 %vm279_vm0, %v168_v8  ;;  %624 = vmatprep.mubr.msk.f32.mxu1 %vm279_vm0, %v176_v9  ;;  %p683_p13 = pneg %p682_p12 }
  0x1e   : > { %236 = vperm.xlu1 %679, %v190_v22   ;;  %231 = vperm.xlu0 %678, %v189_v23  }
  0x1f   : > { %p690_p3 = pnand %p689_p2, %p683_p13 }
  0x20   : > { %613 = vmatmul.mubr.msk.f32.gmra.mrb[2].mxu0 %vm279_vm0, %v169_v12  ;;  %625 = vmatmul.mubr.msk.f32.gmra.mrb[2].mxu1 %vm279_vm0, %v177_v13 }
  0x21   : > { %615 = vmatprep.mubr.msk.f32.mxu0 %vm279_vm0, %v170_v14  ;;  %627 = vmatprep.mubr.msk.f32.mxu1 %vm279_vm0, %v178_v15 }
  0x22   : > { %246 = vperm.xlu1 %679, %v192_v26   ;;  %241 = vperm.xlu0 %678, %v191_v27  }
  0x24   : > { %616 = vmatmul.mubr.msk.f32.gmra.mrb[4].mxu0 %vm279_vm0, %v171_v18  ;;  %628 = vmatmul.mubr.msk.f32.gmra.mrb[4].mxu1 %vm279_vm0, %v179_v19 }
  0x25   : > { %618 = vmatprep.mubr.msk.f32.mxu0 %vm279_vm0, %v172_v20  ;;  %630 = vmatprep.mubr.msk.f32.mxu1 %vm279_vm0, %v180_v21 }
  0x26   : > { %256 = vperm.xlu1 %679, %v194_v28   ;;  %251 = vperm.xlu0 %678, %v193_v29  }
  0x28   : > { %619 = vmatmul.mubr.msk.f32.gmra.mrb[6].mxu0 %vm279_vm0, %v173_v24  ;;  %631 = vmatmul.mubr.msk.f32.gmra.mrb[6].mxu1 %vm279_vm0, %v181_v25 }
  0x2a   : > { %266 = vperm.xlu1 %679, %v196_v30   ;;  %261 = vperm.xlu0 %678, %v195_v31  }
  0x2e   : > { %276 = vperm.xlu1 %679, %v198_v32   ;;  %271 = vperm.xlu0 %678, %v197_v33  }
  0x8f   : > { %v212_v34 = vpop.permute.xlu1 %211  ;;  %v202_v35 = vpop.permute.xlu0 %201 }
  0x93   : > { %v217_v36 = vpop.permute.xlu1 %216  ;;  %v207_v37 = vpop.permute.xlu0 %206 }
  0x97   : > { %v227_v38 = vpop.permute.xlu1 %226  ;;  %v222_v39 = vpop.permute.xlu0 %221 }
  0x9d   : > { %v237_v40 = vpop.permute.xlu1 %236  ;;  %v232_v41 = vpop.permute.xlu0 %231 }
  0xa1   : > { %v247_v42 = vpop.permute.xlu1 %246  ;;  %v242_v43 = vpop.permute.xlu0 %241 }
  0xa5   : > { %v257_v44 = vpop.permute.xlu1 %256  ;;  %v252_v45 = vpop.permute.xlu0 %251 }
  0xa9   : > { %v267_v54 = vpop.permute.xlu1 %266  ;;  %v262_v55 = vpop.permute.xlu0 %261 }
  0xad   : > { %v277_v8 = vpop.permute.xlu1 %276  ;;  %v272_v9 = vpop.permute.xlu0 %271 }
  0xef   : > { %v611_v46 = vpop.f32.mrb[0].mxu0  ;;  %v623_v47 = vpop.f32.mrb[0].mxu1 }
  0xf0   : > { %v400_v48 = vadd.f32 %v611_v46, %v207_v37  ;;  %v440_v49 = vadd.f32 %v623_v47, %v247_v42  ;;  %v394_v50 = vpop.f32.mrb[1].mxu0  ;;  %v434_v51 = vpop.f32.mrb[1].mxu1 }
  0xf1   : > { %v395_v52 = vadd.f32 %v394_v50, %v202_v35  ;;  %v435_v53 = vadd.f32 %v434_v51, %v242_v43 }
  0xf2   : > { %474 = vst [vmem:[%s937_s20 + $0x8] sm:$0xff] %v400_v48  ;;  %482 = vst [vmem:[%s937_s20 + $0x48] sm:$0xff] %v440_v49 }
  0xf3   : > { %473 = vst [vmem:[%s937_s20] sm:$0xff] %v395_v52  ;;  %481 = vst [vmem:[%s937_s20 + $0x40] sm:$0xff] %v435_v53  ;;  %v614_v56 = vpop.f32.mrb[2].mxu0  ;;  %v626_v57 = vpop.f32.mrb[2].mxu1 }
  0xf4   : > { %v410_v58 = vadd.f32 %v614_v56, %v217_v36  ;;  %v450_v59 = vadd.f32 %v626_v57, %v257_v44  ;;  %v404_v60 = vpop.f32.mrb[3].mxu0  ;;  %v444_v61 = vpop.f32.mrb[3].mxu1 }
  0xf5   : > { %v405_v62 = vadd.f32 %v404_v60, %v212_v34  ;;  %v445_v63 = vadd.f32 %v444_v61, %v252_v45 }
  0xf6   : > { %476 = vst [vmem:[%s937_s20 + $0x18] sm:$0xff] %v410_v58  ;;  %484 = vst [vmem:[%s937_s20 + $0x58] sm:$0xff] %v450_v59 }
  0xf7   : > { %475 = vst [vmem:[%s937_s20 + $0x10] sm:$0xff] %v405_v62  ;;  %483 = vst [vmem:[%s937_s20 + $0x50] sm:$0xff] %v445_v63  ;;  %v617_v0 = vpop.f32.mrb[4].mxu0  ;;  %v629_v1 = vpop.f32.mrb[4].mxu1 }
  0xf8   : > { %v420_v2 = vadd.f32 %v617_v0, %v227_v38  ;;  %v460_v3 = vadd.f32 %v629_v1, %v267_v54  ;;  %v414_v4 = vpop.f32.mrb[5].mxu0  ;;  %v454_v5 = vpop.f32.mrb[5].mxu1 }
  0xf9   : > { %v415_v6 = vadd.f32 %v414_v4, %v222_v39  ;;  %v455_v7 = vadd.f32 %v454_v5, %v262_v55 }
  0xfa   : > { %478 = vst [vmem:[%s937_s20 + $0x28] sm:$0xff] %v420_v2  ;;  %486 = vst [vmem:[%s937_s20 + $0x68] sm:$0xff] %v460_v3 }
  0xfb   : > { %477 = vst [vmem:[%s937_s20 + $0x20] sm:$0xff] %v415_v6  ;;  %485 = vst [vmem:[%s937_s20 + $0x60] sm:$0xff] %v455_v7  ;;  %v620_v10 = vpop.f32.mrb[6].mxu0  ;;  %v632_v11 = vpop.f32.mrb[6].mxu1 }
  0xfc   : > { %v430_v12 = vadd.f32 %v620_v10, %v237_v40  ;;  %v470_v13 = vadd.f32 %v632_v11, %v277_v8  ;;  %v424_v14 = vpop.f32.mrb[7].mxu0  ;;  %v464_v15 = vpop.f32.mrb[7].mxu1 }
  0xfd   : > { %v425_v16 = vadd.f32 %v424_v14, %v232_v41  ;;  %v465_v17 = vadd.f32 %v464_v15, %v272_v9 }
  0xfe   : > { %480 = vst [vmem:[%s937_s20 + $0x38] sm:$0xff] %v430_v12  ;;  %488 = vst [vmem:[%s937_s20 + $0x78] sm:$0xff] %v470_v13 }
  0xff   : > { %479 = vst [vmem:[%s937_s20 + $0x30] sm:$0xff] %v425_v16  ;;  %487 = vst [vmem:[%s937_s20 + $0x70] sm:$0xff] %v465_v17 }
 0x100   : > { %693 = shalt.err (!%p690_p3)
}
 0x101   : > { %s694_s6 = scalar_lea.hbm %s956_s16, 2048  ;;  %s698_s9 = scalar_lea.hbm %s1010_s3, 6144 }
 0x102   : > { %p695_p4 = scmp.ne.s32.totalorder %s956_s16, %s694_s6  ;;  %p699_p9 = scmp.lt.u32.totalorder %s956_s16, %s1010_s3 }
 0x103   : > { %p700_p10 = scmp.lt.u32.totalorder %s698_s9, %s694_s6  ;;  %p702_p12 = scmp.lt.u32.totalorder %s694_s6, %s956_s16 }
 0x104   : > { %p696_p7 = pnand %p695_p4, %p807_p5 }
 0x105   : > { %p701_p11 = por %p700_p10, %p699_p9 }
 0x106   : > { %p697_p8 = pneg %p696_p7 }
 0x107   : > { %p703_p13 = por %p702_p12, %p701_p11 }
 0x109   : > { %p704_p0 = pnand %p703_p13, %p697_p8 }
 0x10b   : > { %707 = shalt.err (!%p704_p0)
}
 0x10c   : > { %s746_s17 = smov 128   ;;  %s747_s19 = smov 384  }
 0x10d   : > { %s748_s20 = smov 8  }
 0x10e   : > { %635 = dma.vmem_to_hbm [thread:$0]  (%p807_p5), %s958_s25, 2048, %s956_s16, %s966_s28, %s746_s17, %s747_s19, %s748_s20  }
 0x10f PF: > { %p641_p1 = scmp.ge.s32.totalorder %s742_s15, 2  ;;  %s517_s24 = sand.u32 1, %s730_s12  }
 0x110   : > { %s518_s26 = scalar_lea.sflag [#allocation3], %s517_s24 }
 0x111   : > { %p638_p2 = pnand %p641_p1, %p811_p6 }
 0x113   : > { %725 = dma.done.wait (!%p638_p2), %s518_s26, 2048  }
 0x114   : > { %727 = vsyncadd (!%p638_p2), %s518_s26, 4294965248  ;;  %p13_p3 = scmp.ge.s32.totalorder %s794_s18, 5   ;;  %s1013_s12 = smov %s734_s13 }
 0x115   : > { %s1014_s13 = smov %s738_s14  ;;  %s1015_s14 = smov %s805_s21 }
 0x116   : > { %s1016_s15 = smov %s794_s18  ;;  %15 = sbr.rel (!%p13_p3) target bundleno = 3 (0x3), region = 67 }
 0x11d   :  { %523 = vsyncpa [#allocation3], 1 }
 0x11e   :  { %525 = vsyncpa [#allocation3 + $0x1], 1 }

</bundles_post_ra>
